<compile_context>
chip_gen: v7x
topology: tpu7x:2x2x1
jax: 0.10.0
libtpu: 0.0.40
codegen_flags: <defaults>
</compile_context>

<pallas_src>
import math
import jax
import jax.numpy as jnp
from jax.experimental import pallas as pl
from jax.experimental.pallas import tpu as pltpu


def _round_up(x, m):
    return ((x + m - 1) // m) * m


def _pick_tile(total, target, unit=128):
    """Largest multiple of `unit` that divides `total` and is <= target."""
    t = max((min(target, total) // unit) * unit, unit)
    while t >= unit:
        if total % t == 0:
            return t
        t -= unit
    return total


def _mish(y):
    # Mish: y * tanh(softplus(y)), single-exp stable form.
    #   tanh(ln(1+e^y)) = (e^{2y} + 2 e^y) / (e^{2y} + 2 e^y + 2)
    # evaluated with t = exp(-|y|) to avoid overflow.
    t = jnp.exp(-jnp.abs(y))
    t2 = t * t
    pos = y >= 0.0
    num = jnp.where(pos, 1.0 + 2.0 * t, t2 + 2.0 * t)
    den = jnp.where(pos, 1.0 + 2.0 * t + 2.0 * t2, t2 + 2.0 * t + 2.0)
    return y * num * pl.reciprocal(den, approx=True)


def _kernel_single_k(patches_ref, w_ref, bias_ref, o_ref):
    # patches: (tm, Kp) bf16 ; w: (Kp, tn) bf16 ; bias: (1, tn) f32 ; o: (tm, tn) f32
    y = jnp.dot(patches_ref[...], w_ref[...], preferred_element_type=jnp.float32)
    o_ref[...] = _mish(y + bias_ref[...]).astype(o_ref.dtype)


def _kernel_multi_k(patches_ref, w_ref, bias_ref, o_ref, acc_ref):
    kk = pl.program_id(2)

    @pl.when(kk == 0)
    def _():
        acc_ref[...] = jnp.zeros_like(acc_ref)

    acc_ref[...] += jnp.dot(patches_ref[...], w_ref[...],
                            preferred_element_type=jnp.float32)

    @pl.when(kk == pl.num_programs(2) - 1)
    def _():
        y = acc_ref[...] + bias_ref[...]
        o_ref[...] = _mish(y).astype(o_ref.dtype)


def basic_conv_forward(x, weight, gamma, beta, running_mean, running_var,
                       stride=1, eps=1e-5, tm=512, tn=512, tk=512):
    """x: (N, C_in, H, W) f32, weight: (C_out, C_in, k, k) f32. Returns NCHW f32."""
    N, C_in, H, W = x.shape
    C_out, _, k, _ = weight.shape
    pad = k // 2

    # ---- im2col (glue, plain JAX, bf16) ----
    xb = x.astype(jnp.bfloat16)
    xp = jnp.pad(xb, ((0, 0), (0, 0), (pad, pad), (pad, pad)))
    H_out = (H + 2 * pad - k) // stride + 1
    W_out = (W + 2 * pad - k) // stride + 1
    cols = []
    for dy in range(k):
        for dx in range(k):
            cols.append(xp[:, :, dy:dy + stride * H_out:stride,
                              dx:dx + stride * W_out:stride])
    # (k*k, N, C_in, Ho, Wo) -> (N, Ho, Wo, C_in, k*k) -> (M, K)
    patches = jnp.stack(cols, axis=0).transpose(1, 3, 4, 2, 0)
    M = N * H_out * W_out
    K = C_in * k * k
    patches = patches.reshape(M, K)

    # ---- fold BatchNorm (inference / running stats) ----
    scale = gamma / jnp.sqrt(running_var + eps)          # (C_out,)
    bias = beta - running_mean * scale                   # (C_out,)
    # weight (C_out, C_in, k, k) -> (K, C_out), BN scale folded into the weights
    w_mat = (weight.reshape(C_out, K).T * scale[None, :]).astype(jnp.bfloat16)

    # ---- pad / tile to MXU- and lane-friendly shapes ----
    Kp = _round_up(K, 128)
    Cp = _round_up(C_out, 128)
    tm = _round_up(min(tm, M), 8)
    Mp = _round_up(M, tm)
    tk = _pick_tile(Kp, tk)
    tn = _pick_tile(Cp, tn)
    mt, nt, kt = Mp // tm, Cp // tn, Kp // tk

    patches_p = jnp.pad(patches, ((0, Mp - M), (0, Kp - K)))
    w_p = jnp.pad(w_mat, ((0, Kp - K), (0, Cp - C_out)))
    bias_p = jnp.pad(bias, (0, Cp - C_out)).reshape(1, Cp).astype(jnp.float32)

    cost = pl.CostEstimate(
        flops=2 * Mp * Kp * Cp,
        transcendentals=Mp * Cp,
        bytes_accessed=(patches_p.size * 2 + w_p.size * 2
                        + bias_p.size * 4 + Mp * Cp * 4),
    )

    if kt == 1:
        kernel = _kernel_single_k
        grid = (mt, nt)
        in_specs = [
            pl.BlockSpec((tm, Kp), lambda i, j: (i, 0)),   # patch tiles stream over M
            pl.BlockSpec((Kp, tn), lambda i, j: (0, j)),   # weight tiles over C_out
            pl.BlockSpec((1, tn), lambda i, j: (0, j)),    # folded BN bias
        ]
        out_spec = pl.BlockSpec((tm, tn), lambda i, j: (i, j))
        scratch = []
        dim_sem = ("parallel", "parallel")
    else:
        kernel = _kernel_multi_k
        grid = (mt, nt, kt)
        in_specs = [
            pl.BlockSpec((tm, tk), lambda i, j, kk: (i, kk)),
            pl.BlockSpec((tk, tn), lambda i, j, kk: (kk, j)),
            pl.BlockSpec((1, tn), lambda i, j, kk: (0, j)),
        ]
        out_spec = pl.BlockSpec((tm, tn), lambda i, j, kk: (i, j))
        scratch = [pltpu.VMEM((tm, tn), jnp.float32)]
        dim_sem = ("parallel", "parallel", "arbitrary")

    out_flat = pl.pallas_call(
        kernel,
        out_shape=jax.ShapeDtypeStruct((Mp, Cp), jnp.float32),
        grid_spec=pltpu.PrefetchScalarGridSpec(
            num_scalar_prefetch=0,
            grid=grid,
            in_specs=in_specs,
            out_specs=out_spec,
            scratch_shapes=scratch),
        compiler_params=pltpu.CompilerParams(dimension_semantics=dim_sem),
        cost_estimate=cost,
    )(patches_p, w_p, bias_p)

    # Un-pad, then (M, C_out) -> (N, C_out, H_out, W_out) to match the module.
    out = out_flat[:M, :C_out]
    return out.reshape(N, H_out, W_out, C_out).transpose(0, 3, 1, 2)


def _reference(x, weight, gamma, beta, running_mean, running_var,
               stride=1, eps=1e-5):
    """Mirrors the kernel's bf16 input/folded-weight quantization; f32 conv."""
    pad = weight.shape[-1] // 2
    scale = gamma / jnp.sqrt(running_var + eps)
    bias = beta - running_mean * scale
    xq = x.astype(jnp.bfloat16).astype(jnp.float32)
    wq = (weight * scale[:, None, None, None]).astype(jnp.bfloat16).astype(jnp.float32)
    y = jax.lax.conv_general_dilated(
        xq, wq, window_strides=(stride, stride),
        padding=((pad, pad), (pad, pad)),
        dimension_numbers=("NCHW", "OIHW", "NCHW"))
    y = y + bias[None, :, None, None]
    return y * jnp.tanh(jax.nn.softplus(y))


def _make_params(key, N, C_in, H, W, C_out, k):
    k_x, k_w, k_g, k_b, k_m, k_v = jax.random.split(key, 6)
    x = jax.random.normal(k_x, (N, C_in, H, W), dtype=jnp.float32)
    fan_in = C_in * k * k
    weight = jax.random.normal(k_w, (C_out, C_in, k, k), dtype=jnp.float32) / math.sqrt(fan_in)
    gamma = 1.0 + 0.1 * jax.random.normal(k_g, (C_out,), dtype=jnp.float32)
    beta = 0.1 * jax.random.normal(k_b, (C_out,), dtype=jnp.float32)
    mean = 0.1 * jax.random.normal(k_m, (C_out,), dtype=jnp.float32)
    var = jnp.abs(1.0 + 0.1 * jax.random.normal(k_v, (C_out,), dtype=jnp.float32))
    return x, weight, gamma, beta, mean, var


if __name__ == "__main__":
    key = jax.random.PRNGKey(0)
    k1, k2 = jax.random.split(key)

    # Case 1: the module's small spec shapes; tm=128 -> multi-step pipelined grid
    # on the M axis, single-K kernel path.
    x, w, g, b, m, v = _make_params(k1, N=2, C_in=4, H=16, W=16, C_out=8, k=3)
    out = basic_conv_forward(x, w, g, b, m, v, stride=1, tm=128)
    out = jax.block_until_ready(out)
    ref = _reference(x, w, g, b, m, v, stride=1)
    assert out.shape == (2, 8, 16, 16)
    assert jnp.allclose(out, ref, atol=1e-2, rtol=1e-2), float(jnp.max(jnp.abs(out - ref)))

    # Case 2: larger channel count with tk=128 to exercise the K-reduction
    # (accumulator) kernel path: K = 32*9 = 288 -> Kp = 384 -> kt = 3.
    x2, w2, g2, b2, m2, v2 = _make_params(k2, N=2, C_in=32, H=8, W=8, C_out=16, k=3)
    out2 = basic_conv_forward(x2, w2, g2, b2, m2, v2, stride=1, tm=64, tk=128, tn=128)
    out2 = jax.block_until_ready(out2)
    ref2 = _reference(x2, w2, g2, b2, m2, v2, stride=1)
    assert out2.shape == (2, 16, 8, 8)
    assert jnp.allclose(out2, ref2, atol=1e-2, rtol=1e-2), float(jnp.max(jnp.abs(out2 - ref2)))

    print("KERNEL_OK")
</pallas_src>

<mosaic_0001>
module attributes {stable_mosaic.version = 11 : i64} {
  func.func @_kernel_single_k(%arg0: i32, %arg1: i32, %arg2: memref<128x128xbf16, #tpu.memory_space<vmem>>, %arg3: memref<128x128xbf16, #tpu.memory_space<vmem>>, %arg4: memref<1x128xf32, #tpu.memory_space<vmem>>, %arg5: memref<128x128xf32, #tpu.memory_space<vmem>>) attributes {dimension_semantics = [#tpu.dimension_semantics<parallel>, #tpu.dimension_semantics<parallel>], iteration_bounds = array<i64: 4, 1>, scalar_prefetch = 0 : i64, scratch_operands = 0 : i64, tpu.core_type = #tpu.core_type<tc>, window_params = [{transform_indices = @transform_0, window_bounds = array<i64: 128, 128>}, {transform_indices = @transform_1, window_bounds = array<i64: 128, 128>}, {transform_indices = @transform_2, window_bounds = array<i64: 1, 128>}, {transform_indices = @transform_3, window_bounds = array<i64: 128, 128>}]} {
    %c0 = arith.constant 0 : index
    %c0_0 = arith.constant 0 : index
    %0 = vector.load %arg2[%c0, %c0_0] : memref<128x128xbf16, #tpu.memory_space<vmem>>, vector<128x128xbf16>
    %c0_1 = arith.constant 0 : index
    %c0_2 = arith.constant 0 : index
    %1 = vector.load %arg3[%c0_1, %c0_2] : memref<128x128xbf16, #tpu.memory_space<vmem>>, vector<128x128xbf16>
    %cst = arith.constant dense<0.000000e+00> : vector<128x128xf32>
    %2 = tpu.matmul %0, %1, %cst {dimension_numbers = #tpu.dot_dimension_numbers<[1], [0], [0], [1], [0, 0, 1, 1], [], []>} : vector<128x128xbf16>, vector<128x128xbf16>, vector<128x128xf32> -> vector<128x128xf32>
    %c0_3 = arith.constant 0 : index
    %c0_4 = arith.constant 0 : index
    %3 = vector.load %arg4[%c0_3, %c0_4] : memref<1x128xf32, #tpu.memory_space<vmem>>, vector<1x128xf32>
    %4 = vector.broadcast %3 : vector<1x128xf32> to vector<128x128xf32>
    %5 = arith.addf %2, %4 : vector<128x128xf32>
    %6 = math.absf %5 : vector<128x128xf32>
    %cst_5 = arith.constant 0.000000e+00 : f32
    %7 = vector.broadcast %cst_5 : f32 to vector<128x128xf32>
    %8 = arith.subf %7, %6 : vector<128x128xf32>
    %9 = math.exp %8 : vector<128x128xf32>
    %10 = arith.mulf %9, %9 : vector<128x128xf32>
    %cst_6 = arith.constant 0.000000e+00 : f32
    %11 = vector.broadcast %cst_6 : f32 to vector<128x128xf32>
    %12 = arith.cmpf oge, %5, %11 : vector<128x128xf32>
    %cst_7 = arith.constant 2.000000e+00 : f32
    %13 = vector.broadcast %cst_7 : f32 to vector<128x128xf32>
    %14 = arith.mulf %13, %9 : vector<128x128xf32>
    %cst_8 = arith.constant 1.000000e+00 : f32
    %15 = vector.broadcast %cst_8 : f32 to vector<128x128xf32>
    %16 = arith.addf %15, %14 : vector<128x128xf32>
    %cst_9 = arith.constant 2.000000e+00 : f32
    %17 = vector.broadcast %cst_9 : f32 to vector<128x128xf32>
    %18 = arith.mulf %17, %9 : vector<128x128xf32>
    %19 = arith.addf %10, %18 : vector<128x128xf32>
    %20 = arith.select %12, %16, %19 : vector<128x128xi1>, vector<128x128xf32>
    %cst_10 = arith.constant 2.000000e+00 : f32
    %21 = vector.broadcast %cst_10 : f32 to vector<128x128xf32>
    %22 = arith.mulf %21, %9 : vector<128x128xf32>
    %cst_11 = arith.constant 1.000000e+00 : f32
    %23 = vector.broadcast %cst_11 : f32 to vector<128x128xf32>
    %24 = arith.addf %23, %22 : vector<128x128xf32>
    %cst_12 = arith.constant 2.000000e+00 : f32
    %25 = vector.broadcast %cst_12 : f32 to vector<128x128xf32>
    %26 = arith.mulf %25, %10 : vector<128x128xf32>
    %27 = arith.addf %24, %26 : vector<128x128xf32>
    %cst_13 = arith.constant 2.000000e+00 : f32
    %28 = vector.broadcast %cst_13 : f32 to vector<128x128xf32>
    %29 = arith.mulf %28, %9 : vector<128x128xf32>
    %30 = arith.addf %10, %29 : vector<128x128xf32>
    %cst_14 = arith.constant 2.000000e+00 : f32
    %31 = vector.broadcast %cst_14 : f32 to vector<128x128xf32>
    %32 = arith.addf %30, %31 : vector<128x128xf32>
    %33 = arith.select %12, %27, %32 : vector<128x128xi1>, vector<128x128xf32>
    %34 = arith.mulf %5, %20 : vector<128x128xf32>
    %35 = tpu.reciprocal %33 {approx = true} : vector<128x128xf32> -> vector<128x128xf32>
    %36 = arith.mulf %34, %35 : vector<128x128xf32>
    %c0_15 = arith.constant 0 : index
    %c0_16 = arith.constant 0 : index
    %37 = vector.load %arg5[%c0_15, %c0_16] : memref<128x128xf32, #tpu.memory_space<vmem>>, vector<128x128xf32>
    tpu.vector_store %arg5[%c0_15, %c0_16], %36 {strides = array<i32>} : memref<128x128xf32, #tpu.memory_space<vmem>>, vector<128x128xf32>,
    return
  }
  func.func @transform_0(%arg0: i32, %arg1: i32) -> (i32, i32) {
    %c0_i32 = arith.constant 0 : i32
    %c0_i32_0 = arith.constant 0 : i32
    return %arg0, %c0_i32 : i32, i32
  }
  func.func @transform_1(%arg0: i32, %arg1: i32) -> (i32, i32) {
    %c0_i32 = arith.constant 0 : i32
    %c0_i32_0 = arith.constant 0 : i32
    return %c0_i32, %arg1 : i32, i32
  }
  func.func @transform_2(%arg0: i32, %arg1: i32) -> (i32, i32) {
    %c0_i32 = arith.constant 0 : i32
    %c0_i32_0 = arith.constant 0 : i32
    return %c0_i32, %arg1 : i32, i32
  }
  func.func @transform_3(%arg0: i32, %arg1: i32) -> (i32, i32) {
    %c0_i32 = arith.constant 0 : i32
    return %arg0, %arg1 : i32, i32
  }
}

</mosaic_0001>

<bundles_post_ra>
// kernel: tpu_custom_call.1
= control target key start
LH: loop header
LB: loop body
LE: loop exit
PB: predicated region body
PF: predicated region fallthrough
CT: control target
= control target key end

     0   :  { %8 = vsyncpa [#allocation3], 0  ;;  %s1741_s0 = inlined_call_operand.hbm [shape: bf16[512,128], index: 0, kind: input, shape index: {}]   ;;  %s1742_s1 = inlined_call_operand.hbm [shape: bf16[128,128], index: 1, kind: input, shape index: {}]   ;;  %s1743_s2 = inlined_call_operand.vmem [shape: f32[1,128], index: 2, kind: input, shape index: {}]   ;;  %s1744_s3 = inlined_call_operand.hbm [shape: f32[512,128], index: 3, kind: output, shape index: {}]  }
   0x1   :  { %10 = vsyncpa [#allocation3 + $0x1], 0 }
   0x2   :  { %11 = vsyncpa [#allocation6], 0 }
   0x3   :  { %12 = vsyncpa [#allocation4], 0 }
   0x4   :  { %14 = vsyncpa [#allocation4 + $0x1], 0  ;;  %s1315_s12 = smov 0   ;;  %s1317_s13 = smov 0  }
   0x5   :  { %s1319_s14 = smov 0   ;;  %s1321_s15 = smov 0  }
   0x6   :  { %s1323_s16 = smov 0   ;;  %s1325_s17 = smov 0  }
   0x7 LB: > { %s884_s18 = sadd.s32 4294967295, %s1286_s17   ;;  %s885_s19 = sadd.s32 4294967294, %s1286_s17   ;;  %s1286_s17 = sphi %s1325_s17, %s20_s17   ;;  %s1282_s16 = sphi %s1323_s16, %s1767_s16   ;;  %s1278_s15 = sphi %s1321_s15, %s1766_s15   ;;  %s1274_s14 = sphi %s1319_s14, %s1765_s14   ;;  %s1270_s13 = sphi %s1317_s13, %s1764_s13   ;;  %s1266_s12 = sphi %s1315_s12, %s1763_s12  }
   0x8   : > { %p52_p0 = scmp.ne.s32.totalorder %s1270_s13, %s1266_s12  ;;  %p1349_p1 = scmp.eq.s32.totalorder %s884_s18, 0 }
   0x9   : > { %p1353_p2 = scmp.eq.s32.totalorder %s884_s18, 3  ;;  %p136_p3 = scmp.eq.s32.totalorder %s885_s19, 3 }
   0xa   : > { %s1749_s20 = scalar_select %p1349_p1, 1, 0 }
   0xb   : > { %s1750_s21 = scalar_select %p1353_p2, 1, 0 }
   0xc   : > { %p1359_p4 = por %p1349_p1, %p52_p0  ;;  %p886_p5 = scmp.ge.s32.totalorder %s1286_s17, 1 }
   0xd   : > { %p1364_p6 = por %p136_p3, %p52_p0  ;;  %p143_p7 = scmp.lt.s32.totalorder %s1286_s17, 5 }
   0xe   : > { %s1751_s22 = scalar_select %p1359_p4, 1, 0 }
   0xf   : > { %s1752_s23 = scalar_select %p1364_p6, 1, 0 }
  0x10   : > { %p1369_p8 = pnand %p886_p5, %p143_p7  ;;  %s1288_s25 = smov [#allocation5]  }
  0x11   : > { %s157_s26 = sshll.u32 %s1288_s25, 4  ;;  %s32_s28 = sadd.s32 1, %s1282_s16  ;;  %s158_s26 = int_to_ptr.vmem [resolvable:$true] %s157_s26 }
  0x12   : > { %s1753_s24 = scalar_select %p1369_p8, 1, 0 }
  0x13   : > { %p993_p9 = pneg %p1369_p8  ;;  %s1142_s4 = scalar_lea.hbm %s1742_s1, 1024 }
  0x14   : > { %p1143_p11 = scmp.ne.s32.totalorder %s1742_s1, %s1142_s4  ;;  %p1149_p3 = scmp.lt.u32.totalorder %s1142_s4, %s1742_s1 }
  0x15   : > { %p1377_p10 = pnand %p993_p9, %p1349_p1 }
  0x17   : > { %p1144_p12 = pneg %p1377_p10 }
  0x19   : > { %p1145_p13 = pnand %p1144_p12, %p1143_p11 }
  0x1b   : > { %p1146_p0 = pneg %p1145_p13 }
  0x1d   : > { %p1151_p5 = pnand %p1149_p3, %p1146_p0 }
  0x1f   : > { %1154 = shalt.err (!%p1151_p5)
}
  0x20   : > { %s1155_s9 = scalar_lea.vmem %s158_s26, 1024  ;;  %p1163_p1 = scmp.lt.s32.totalorder %s158_s26, %s158_s26 }
  0x21   : > { %p1156_p7 = scmp.ne.s32.totalorder %s158_s26, %s1155_s9  ;;  %p1164_p4 = scmp.lt.s32.totalorder %s1155_s9, %s1155_s9 }
  0x23   : > { %p1158_p9 = pnand %p1156_p7, %p1144_p12  ;;  %p1165_p8 = por %p1164_p4, %p1163_p1 }
  0x25   : > { %p1159_p6 = pneg %p1158_p9 }
  0x27   : > { %p1166_p2 = pnand %p1165_p8, %p1159_p6 }
  0x29   : > { %1169 = shalt.err (!%p1166_p2)
}
  0x2a   : > { %s1289_s10 = smov 64   ;;  %s1290_s11 = smov 4  }
  0x2b   : > { %996 = dma.hbm_to_vmem [thread:$0]  (!%p1377_p10), %s1742_s1, 1024, %s158_s26, [#allocation6], %s1289_s10, %s1289_s10, %s1290_s11  }
  0x2c   : > { %p34_p1 = scmp.ge.s32.totalorder %s32_s28, 4  ;;  %s39_s25 = sadd.s32 1, %s1274_s14 }
  0x2d   : > { %p46_p2 = scmp.ne.s32.totalorder %s1274_s14, %s1270_s13  ;;  %p47_p4 = scmp.eq.s32.totalorder %s1286_s17, 0 }
  0x2e   : > { %s1769_s28 = smov (%p34_p1, %s32_s28), 0  ;;  %p1756_p8 = scmp.ne.s32.totalorder %s1750_s21, 0 }
  0x2f   : > { %p1407_p6 = por %p47_p4, %p46_p2  ;;  %s36_s30 = ssub.s32 %s1282_s16, %s1769_s28 }
  0x30   : > { %p1413_p11 = por %p1756_p8, %p46_p2  ;;  %p1006_p12 = scmp.lt.s32.totalorder %s1286_s17, 4 }
  0x31   : > { %p37_p10 = scmp.eq.s32.totalorder %s36_s30, 0  ;;  %s177_s26 = sand.u32 1, %s1274_s14  }
  0x32   : > { %s890_s4 = sshll.u32 %s177_s26, 6  ;;  %s919_s6 = sshll.u32 %s1282_s16, 10 }
  0x33   : > { %s1422_s5 = scalar_select %p37_p10, %s1274_s14, %s39_s25  }
  0x34   : > { %s1428_s9 = scalar_lea.hbm %s1741_s0, %s919_s6  ;;  %s181_s21 = scalar_lea.vmem [#allocation2], %s890_s4 }
  0x35   : > { %s188_s18 = sshll.u32 %s181_s21, 4  ;;  %p1434_p13 = pnand %p1006_p12, %p1407_p6  ;;  %s1430_s18 = int_to_ptr.vmem [resolvable:$true] %s188_s18 }
  0x36   : > { %s1438_s25 = scalar_lea.sflag [#allocation3], %s177_s26  ;;  %s1170_s30 = scalar_lea.hbm %s1428_s9, 1024 }
  0x37   : > { %p1171_p0 = scmp.ne.s32.totalorder %s1428_s9, %s1170_s30  ;;  %p1172_p3 = pneg %p1434_p13 }
  0x38   : > { %s1175_s29 = scalar_lea.hbm %s1741_s0, 4096  ;;  %p1176_p9 = scmp.lt.u32.totalorder %s1428_s9, %s1741_s0 }
  0x39   : > { %p1173_p5 = pnand %p1172_p3, %p1171_p0  ;;  %p1177_p1 = scmp.lt.u32.totalorder %s1175_s29, %s1170_s30 }
  0x3a   : > { %p1179_p4 = scmp.lt.u32.totalorder %s1170_s30, %s1428_s9 }
  0x3b   : > { %p1174_p7 = pneg %p1173_p5  ;;  %p1178_p2 = por %p1177_p1, %p1176_p9 }
  0x3d   : > { %p1180_p6 = por %p1179_p4, %p1178_p2 }
  0x3f   : > { %p1181_p8 = pnand %p1180_p6, %p1174_p7 }
  0x41   : > { %1184 = shalt.err (!%p1181_p8)
}
  0x42   : > { %s1185_s26 = scalar_lea.vmem %s1430_s18, 1024  ;;  %s1291_s21 = smov [#allocation2]  }
  0x43   : > { %p1186_p12 = scmp.ne.s32.totalorder %s1430_s18, %s1185_s26  ;;  %s1190_s4 = sshll.u32 %s1291_s21, 4  ;;  %s1191_s4 = int_to_ptr.vmem [resolvable:$false] %s1190_s4 }
  0x44   : > { %s1192_s6 = scalar_lea.vmem %s1191_s4, 2048  ;;  %p1193_p5 = scmp.lt.s32.totalorder %s1430_s18, %s1191_s4 }
  0x45   : > { %p1188_p10 = pnand %p1186_p12, %p1172_p3  ;;  %p1194_p9 = scmp.lt.s32.totalorder %s1192_s6, %s1185_s26 }
  0x47   : > { %p1189_p0 = pneg %p1188_p10  ;;  %p1195_p1 = por %p1194_p9, %p1193_p5 }
  0x49   : > { %p1196_p2 = pnand %p1195_p1, %p1189_p0 }
  0x4b   : > { %1199 = shalt.err (!%p1196_p2)
}
  0x4c   : > { %1000 = dma.hbm_to_vmem [thread:$0]  (!%p1434_p13), %s1428_s9, 1024, %s1430_s18, %s1438_s25, %s1289_s10, %s1289_s10, %s1290_s11  }
  0x4d   : > { %p1759_p3 = scmp.ne.s32.totalorder %s1753_s24, 0 }
  0x4e   : > { %s1472_s30 = sand.u32 (!%p1759_p3), 1, %s1270_s13   ;;  %p1760_p7 = scmp.ne.s32.totalorder (!%p1759_p3), %s1751_s22, 0 }
  0x4f   : > { %200 = sbr.rel (%p1759_p3) target bundleno = 440 (0x1b8), region = 32  ;;  %s894_s29 = sshll.u32 (!%p1759_p3), %s1472_s30, 6 }
  0x50   : > { %s203_s7 = scalar_lea.sflag (!%p1759_p3), [#allocation3], %s1472_s30  ;;  %s1476_s8 = scalar_lea.vmem (!%p1759_p3), [#allocation2], %s894_s29 }
  0x56   : > { %1253 = dma.done.wait (%p1760_p7), %s203_s7, 1024  }
  0x57   : > { %1255 = vsyncadd (%p1760_p7), %s203_s7, 4294966272  ;;  %p1761_p13 = scmp.ne.s32.totalorder %s1749_s20, 0 }
  0x59   : > { %1257 = dma.done.wait (%p1761_p13), [#allocation6], 1024  }
  0x5a   : > { %1259 = vsyncadd (%p1761_p13), [#allocation6], 4294966272  ;;  %v1062_v0 = vld [vmem:[#allocation5] sm:$0xff]   ;;  %v1063_v1 = vld [vmem:[#allocation5 + $0x8] sm:$0xff]   ;;  %s896_s24 = sshll.u32 %s1472_s30, 7  ;;  %s920_s11 = sshll.u32 %s1278_s15, 11 }
  0x5b   : > { %937 = vmatprep.subr.bf16.mxu0 %v1062_v0  ;;  %969 = vmatprep.subr.bf16.mxu1 %v1062_v0  ;;  %v1064_v2 = vld [vmem:[#allocation5 + $0x10] sm:$0xff]   ;;  %v1065_v3 = vld [vmem:[#allocation5 + $0x18] sm:$0xff]   ;;  %v1070_v4 = vld [vmem:[%s1476_s8] sm:$0xff]   ;;  %s1598_s10 = scalar_lea.vmem [#allocation7], %s896_s24  ;;  %s1690_s25 = scalar_lea.hbm %s1744_s3, %s920_s11 }
  0x5c   : > { %938 = vmatpush3.bf16.msra.mxu0 %v1062_v0  ;;  %977 = vmatpush3.bf16.msra.mxu1 %v1062_v0  ;;  %v1071_v5 = vld [vmem:[%s1476_s8 + $0x20] sm:$0xff]   ;;  %v1067_v7 = vld [vmem:[#allocation5 + $0x28] sm:$0xff]   ;;  %v1068_v8 = vld [vmem:[#allocation5 + $0x30] sm:$0xff]   ;;  %s777_s9 = sshll.u32 %s1598_s10, 4  ;;  %s763_s26 = scalar_lea.sflag [#allocation4], %s1472_s30  ;;  %s1692_s9 = int_to_ptr.vmem [resolvable:$true] %s777_s9 }
  0x5d   : > { %939 = vmatprep.subr.bf16.mxu0 %v1063_v1  ;;  %970 = vmatprep.subr.bf16.mxu1 %v1063_v1  ;;  %v1066_v6 = vld [vmem:[#allocation5 + $0x20] sm:$0xff]   ;;  %v1069_v9 = vld [vmem:[#allocation5 + $0x38] sm:$0xff]   ;;  %v1072_v10 = vld [vmem:[%s1476_s8 + $0x8] sm:$0xff]   ;;  %s1200_s21 = scalar_lea.vmem %s1692_s9, 2048  ;;  %s1292_s15 = smov [#allocation7]  }
  0x5e   : > { %953 = vmatprep.mubr.bf16.mxu0 %v1070_v4  ;;  %961 = vmatprep.mubr.bf16.mxu1 %v1071_v5  ;;  %v1073_v11 = vld [vmem:[%s1476_s8 + $0x28] sm:$0xff]   ;;  %v1074_v12 = vld [vmem:[%s1476_s8 + $0x10] sm:$0xff]   ;;  %v1076_v14 = vld [vmem:[%s1476_s8 + $0x18] sm:$0xff]   ;;  %p1201_p4 = scmp.ne.s32.totalorder %s1692_s9, %s1200_s21  ;;  %s1204_s4 = sshll.u32 %s1292_s15, 4  ;;  %s1205_s4 = int_to_ptr.vmem [resolvable:$false] %s1204_s4 }
  0x5f   : > { %v1075_v13 = vld [vmem:[%s1476_s8 + $0x30] sm:$0xff]   ;;  %v1077_v15 = vld [vmem:[%s1476_s8 + $0x38] sm:$0xff]   ;;  %v1497_v16 = vld [vmem:[%s1743_s2] ss:$0 sm:$0xff]  ;;  %s1206_s6 = scalar_lea.vmem %s1205_s4, 4096  ;;  %p1207_p12 = scmp.lt.s32.totalorder %s1692_s9, %s1205_s4 }
  0x60   : > { %940 = vmatpush3.bf16.msra.mxu0 %v1063_v1  ;;  %978 = vmatpush3.bf16.msra.mxu1 %v1063_v1  ;;  %p1202_p6 = pnand %p1201_p4, %p1413_p11  ;;  %p1208_p10 = scmp.lt.s32.totalorder %s1206_s6, %s1200_s21 }
  0x61   : > { %941 = vmatprep.subr.bf16.mxu0 %v1064_v2  ;;  %971 = vmatprep.subr.bf16.mxu1 %v1064_v2 }
  0x62   : > { %p1203_p8 = pneg %p1202_p6  ;;  %p1209_p0 = por %p1208_p10, %p1207_p12 }
  0x64   : > { %942 = vmatpush3.bf16.msra.mxu0 %v1064_v2  ;;  %979 = vmatpush3.bf16.msra.mxu1 %v1064_v2  ;;  %p1210_p5 = pnand %p1209_p0, %p1203_p8 }
  0x65   : > { %943 = vmatprep.subr.bf16.mxu0 %v1065_v3  ;;  %972 = vmatprep.subr.bf16.mxu1 %v1065_v3 }
  0x68   : > { %944 = vmatpush3.bf16.msra.mxu0 %v1065_v3  ;;  %980 = vmatpush3.bf16.msra.mxu1 %v1065_v3 }
  0x69   : > { %945 = vmatprep.subr.bf16.mxu0 %v1066_v6  ;;  %973 = vmatprep.subr.bf16.mxu1 %v1066_v6 }
  0x6c   : > { %946 = vmatpush3.bf16.msra.mxu0 %v1066_v6  ;;  %981 = vmatpush3.bf16.msra.mxu1 %v1066_v6 }
  0x6d   : > { %947 = vmatprep.subr.bf16.mxu0 %v1067_v7  ;;  %974 = vmatprep.subr.bf16.mxu1 %v1067_v7 }
  0x70   : > { %948 = vmatpush3.bf16.msra.mxu0 %v1067_v7  ;;  %982 = vmatpush3.bf16.msra.mxu1 %v1067_v7 }
  0x71   : > { %949 = vmatprep.subr.bf16.mxu0 %v1068_v8  ;;  %975 = vmatprep.subr.bf16.mxu1 %v1068_v8 }
  0x74   : > { %950 = vmatpush3.bf16.msra.mxu0 %v1068_v8  ;;  %983 = vmatpush3.bf16.msra.mxu1 %v1068_v8 }
  0x75   : > { %951 = vmatprep.subr.bf16.mxu0 %v1069_v9  ;;  %976 = vmatprep.subr.bf16.mxu1 %v1069_v9 }
  0x78   : > { %952 = vmatpush3.bf16.msra.mxu0 %v1069_v9  ;;  %984 = vmatpush3.bf16.msra.mxu1 %v1069_v9 }
  0x7b   : > { %954 = vmatmul.mubr.bf16.vlgmr.msra.gmra.mrb[0].mxu0 %v1072_v10  ;;  %962 = vmatmul.mubr.bf16.vlgmr.msra.gmra.mrb[0].mxu1 %v1073_v11 }
  0x7c   : > { %957 = vmatprep.mubr.bf16.mxu0 %v1074_v12  ;;  %965 = vmatprep.mubr.bf16.mxu1 %v1075_v13 }
  0x83   : > { %958 = vmatmul.mubr.bf16.gmra.mrb[4].mxu0 %v1076_v14  ;;  %966 = vmatmul.mubr.bf16.gmra.mrb[4].mxu1 %v1077_v15 }
 0x14e   : > { %v955_v17 = vpop.f32.mrb[0].mxu0  ;;  %v963_v18 = vpop.f32.mrb[0].mxu1 }
 0x14f   : > { %v1500_v19 = vadd.f32 %v955_v17, %v1497_v16  ;;  %v1503_v20 = vadd.f32 %v963_v18, %v1497_v16  ;;  %v411_v21 = vpop.f32.mrb[1].mxu0  ;;  %v443_v22 = vpop.f32.mrb[1].mxu1 }
 0x150   : > { %v1506_v23 = vadd.f32 %v1497_v16, %v411_v21  ;;  %v1509_v24 = vadd.f32 %v1497_v16, %v443_v22  ;;  %v956_v25 = vpop.f32.mrb[2].mxu0  ;;  %v964_v26 = vpop.f32.mrb[2].mxu1 }
 0x151   : > { %v476_v27 = vand.u32 2147483647, %v1500_v19  ;;  %v484_v28 = vand.u32 2147483647, %v1503_v20  ;;  %v1516_v33 = vadd.f32 %v956_v25, %v1497_v16  ;;  %v1519_v34 = vadd.f32 %v964_v26, %v1497_v16  ;;  %v414_v35 = vpop.f32.mrb[3].mxu0  ;;  %v446_v36 = vpop.f32.mrb[3].mxu1 }
 0x152   : > { %v474_v29 = vand.u32 2147483647, %v1506_v23  ;;  %v482_v30 = vand.u32 2147483647, %v1509_v24  ;;  %v1522_v39 = vadd.f32 %v1497_v16, %v414_v35  ;;  %v1525_v40 = vadd.f32 %v1497_v16, %v446_v36 }
 0x153   : > { %v492_v31 = vsub.f32 0.0, %v476_v27  ;;  %v500_v32 = vsub.f32 0.0, %v484_v28  ;;  %v477_v43 = vand.u32 2147483647, %v1516_v33  ;;  %v485_v46 = vand.u32 2147483647, %v1519_v34 }
 0x154   : > { %v490_v37 = vsub.f32 0.0, %v474_v29  ;;  %v498_v38 = vsub.f32 0.0, %v482_v30  ;;  %v475_v47 = vand.u32 2147483647, %v1522_v39  ;;  %v483_v50 = vand.u32 2147483647, %v1525_v40 }
 0x155   : > { %v510_v41 = vmul.f32 1.442695, %v492_v31  ;;  %v526_v42 = vmul.f32 1.442695, %v500_v32  ;;  %v493_v45 = vsub.f32 0.0, %v477_v43  ;;  %v501_v53 = vsub.f32 0.0, %v485_v46 }
 0x156   : > { %v506_v44 = vmul.f32 1.442695, %v490_v37  ;;  %v959_v48 = vpop.f32.mrb[4].mxu0  ;;  %v522_v49 = vmul.f32 1.442695, %v498_v38  ;;  %v967_v51 = vpop.f32.mrb[4].mxu1 }
 0x157   : > { %1078 = vpow2.f32 %v510_v41  ;;  %v427_v52 = vpop.f32.mrb[5].mxu0  ;;  %v491_v54 = vsub.f32 0.0, %v475_v47  ;;  %v459_v55 = vpop.f32.mrb[5].mxu1  ;;  %v512_v57 = vmul.f32 1.442695, %v493_v45  ;;  %v499_v58 = vsub.f32 0.0, %v483_v50 }
 0x158   : > { %1080 = vpow2.f32 %v526_v42  ;;  %v960_v56 = vpop.f32.mrb[6].mxu0  ;;  %v1532_v59 = vadd.f32 %v959_v48, %v1497_v16  ;;  %v1535_v60 = vadd.f32 %v967_v51, %v1497_v16  ;;  %v968_v61 = vpop.f32.mrb[6].mxu1  ;;  %v528_v63 = vmul.f32 1.442695, %v501_v53 }
 0x159   : > { %1082 = vpow2.f32 %v506_v44  ;;  %v430_v62 = vpop.f32.mrb[7].mxu0  ;;  %v1538_v0 = vadd.f32 %v1497_v16, %v427_v52  ;;  %v1540_v1 = vpop.f32.mrb[7].mxu1  ;;  %v508_v2 = vmul.f32 1.442695, %v491_v54  ;;  %v524_v4 = vmul.f32 1.442695, %v499_v58 }
 0x15a   : > { %1084 = vpow2.f32 %v522_v49  ;;  %v480_v3 = vand.u32 2147483647, %v1532_v59  ;;  %v488_v5 = vand.u32 2147483647, %v1535_v60  ;;  %v1546_v8 = vadd.f32 %v1497_v16, %v459_v55 }
 0x15b   : > { %v478_v6 = vand.u32 2147483647, %v1538_v0  ;;  %1086 = vpow2.f32 %v512_v57  ;;  %v1549_v11 = vadd.f32 %v960_v56, %v1497_v16  ;;  %vm556_vm0 = vcmp.ge.f32.partialorder %v1500_v19, 0.0 }
 0x15c   : > { %v496_v7 = vsub.f32 0.0, %v480_v3  ;;  %1088 = vpow2.f32 %v528_v63  ;;  %v504_v9 = vsub.f32 0.0, %v488_v5  ;;  %vm564_vm1 = vcmp.ge.f32.partialorder %v1503_v20, 0.0 }
 0x15d   : > { %v494_v10 = vsub.f32 0.0, %v478_v6  ;;  %1090 = vpow2.f32 %v508_v2  ;;  %v1554_v14 = vadd.f32 %v968_v61, %v1497_v16  ;;  %v486_v22 = vand.u32 2147483647, %v1546_v8 }
 0x15e   : > { %1092 = vpow2.f32 %v524_v4  ;;  %v518_v13 = vmul.f32 1.442695, %v496_v7  ;;  %v534_v21 = vmul.f32 1.442695, %v504_v9  ;;  %vm554_vm2 = vcmp.ge.f32.partialorder %v1506_v23, 0.0 }
 0x15f   : > { %v1558_v28 = vmul.f32 1.442695, %v494_v10  ;;  %v481_v29 = vand.u32 2147483647, %v1549_v11  ;;  %vm562_vm3 = vcmp.ge.f32.partialorder %v1509_v24, 0.0  ;;  %v1563_v46 = vadd.f32 %v1497_v16, %v430_v62 }
 0x160   : > { %1094 = vpow2.f32 %v518_v13  ;;  %v1565_v49 = vsub.f32 0.0, %v486_v22  ;;  %vm557_vm4 = vcmp.ge.f32.partialorder %v1516_v33, 0.0  ;;  %vm565_vm5 = vcmp.ge.f32.partialorder %v1519_v34, 0.0 }
 0x161   : > { %v1079_v12 = vpop.eup %1078  ;;  %1096 = vpow2.f32 %v534_v21  ;;  %v1572_v63 = vsub.f32 0.0, %v481_v29  ;;  %vm555_vm6 = vcmp.ge.f32.partialorder %v1522_v39, 0.0  ;;  %vm563_vm7 = vcmp.ge.f32.partialorder %v1525_v40, 0.0 }
 0x162   : > { %v1081_v15 = vpop.eup %1080  ;;  %v540_v17 = vmul.f32 %v1079_v12, %v1079_v12  ;;  %v572_v18 = vmul.f32 2.0, %v1079_v12  ;;  %vm560_vm8 = vcmp.ge.f32.partialorder %v1532_v59, 0.0  ;;  %vm568_vm9 = vcmp.ge.f32.partialorder %v1535_v60, 0.0 }
 0x163   : > { %v1083_v25 = vpop.eup %1082  ;;  %v548_v26 = vmul.f32 %v1081_v15, %v1081_v15  ;;  %v580_v27 = vmul.f32 2.0, %v1081_v15  ;;  %vm558_vm10 = vcmp.ge.f32.partialorder %v1538_v0, 0.0  ;;  %vm566_vm11 = vcmp.ge.f32.partialorder %v1546_v8, 0.0 }
 0x164   : > { %v588_v30 = vadd.f32 1.0, %v572_v18  ;;  %v604_v31 = vadd.f32 %v572_v18, %v540_v17  ;;  %v636_v32 = vmul.f32 2.0, %v540_v17  ;;  %v538_v35 = vmul.f32 %v1083_v25, %v1083_v25  ;;  %v1085_v42 = vpop.eup %1084 }
 0x165   : > { %v596_v36 = vadd.f32 1.0, %v580_v27  ;;  %v612_v37 = vadd.f32 %v580_v27, %v548_v26  ;;  %v644_v38 = vmul.f32 2.0, %v548_v26  ;;  %v570_v41 = vmul.f32 2.0, %v1083_v25  ;;  %v1087_v50 = vpop.eup %1086 }
 0x166   : > { %v652_v43 = vadd.f32 %v636_v32, %v588_v30  ;;  %v668_v44 = vadd.f32 2.0, %v604_v31  ;;  %v634_v45 = vmul.f32 2.0, %v538_v35  ;;  %v1089_v54 = vpop.eup %1088  ;;  %v546_v56 = vmul.f32 %v1085_v42, %v1085_v42 }
 0x167   : > { %v660_v47 = vadd.f32 %v644_v38, %v596_v36  ;;  %v676_v48 = vadd.f32 2.0, %v612_v37  ;;  %v586_v52 = vadd.f32 1.0, %v570_v41  ;;  %v602_v53 = vadd.f32 %v570_v41, %v538_v35  ;;  %v1091_v58 = vpop.eup %1090 }
 0x168   : > { %v684_v51 = vsel %vm556_vm0, %v652_v43, %v668_v44  ;;  %v578_v57 = vmul.f32 2.0, %v1085_v42  ;;  %v1093_v2 = vpop.eup %1092  ;;  %v620_v3 = vsel %vm556_vm0, %v588_v30, %v604_v31  ;;  %v642_v6 = vmul.f32 2.0, %v546_v56 }
 0x169   : > { %1098 = vrcp.f32 %v684_v51  ;;  %v692_v55 = vsel %vm564_vm1, %v660_v47, %v676_v48  ;;  %v650_v61 = vadd.f32 %v634_v45, %v586_v52  ;;  %v666_v62 = vadd.f32 2.0, %v602_v53 }
 0x16a   : > { %1100 = vrcp.f32 %v692_v55  ;;  %v594_v4 = vadd.f32 1.0, %v578_v57  ;;  %v610_v5 = vadd.f32 %v578_v57, %v546_v56  ;;  %v541_v9 = vmul.f32 %v1087_v50, %v1087_v50 }
 0x16b   : > { %v682_v7 = vsel %vm554_vm2, %v650_v61, %v666_v62  ;;  %v573_v10 = vmul.f32 2.0, %v1087_v50  ;;  %v549_v12 = vmul.f32 %v1089_v54, %v1089_v54  ;;  %v628_v13 = vsel %vm564_vm1, %v596_v36, %v612_v37  ;;  %v1095_v36 = vpop.eup %1094 }
 0x16c   : > { %1102 = vrcp.f32 %v682_v7  ;;  %v658_v15 = vadd.f32 %v642_v6, %v594_v4  ;;  %v674_v17 = vadd.f32 2.0, %v610_v5  ;;  %v700_v18 = vmul.f32 %v620_v3, %v1500_v19  ;;  %v1097_v42 = vpop.eup %1096 }
 0x16d   : > { %v589_v21 = vadd.f32 1.0, %v573_v10  ;;  %v605_v22 = vadd.f32 %v573_v10, %v541_v9  ;;  %v637_v25 = vmul.f32 2.0, %v541_v9  ;;  %v581_v27 = vmul.f32 2.0, %v1089_v54 }
 0x16e   : > { %v690_v26 = vsel %vm562_vm3, %v658_v15, %v674_v17  ;;  %v645_v29 = vmul.f32 2.0, %v549_v12  ;;  %v539_v30 = vmul.f32 %v1091_v58, %v1091_v58  ;;  %v708_v31 = vmul.f32 %v628_v13, %v1503_v20 }
 0x16f   : > { %1104 = vrcp.f32 %v690_v26  ;;  %v653_v32 = vadd.f32 %v637_v25, %v589_v21  ;;  %v669_v35 = vadd.f32 2.0, %v605_v22  ;;  %v618_v19 = vsel %vm554_vm2, %v586_v52, %v602_v53 }
 0x170   : > { %v597_v37 = vadd.f32 1.0, %v581_v27  ;;  %v613_v38 = vadd.f32 %v581_v27, %v549_v12  ;;  %v571_v41 = vmul.f32 2.0, %v1091_v58  ;;  %v635_v44 = vmul.f32 2.0, %v539_v30 }
 0x171   : > { %v685_v43 = vsel %vm557_vm4, %v653_v32, %v669_v35  ;;  %v547_v45 = vmul.f32 %v1093_v2, %v1093_v2  ;;  %v579_v47 = vmul.f32 2.0, %v1093_v2  ;;  %v626_v48 = vsel %vm562_vm3, %v594_v4, %v610_v5 }
 0x172   : > { %1106 = vrcp.f32 %v685_v43  ;;  %v661_v50 = vadd.f32 %v645_v29, %v597_v37  ;;  %v677_v51 = vadd.f32 2.0, %v613_v38  ;;  %v621_v54 = vsel %vm557_vm4, %v589_v21, %v605_v22 }
 0x173   : > { %v1099_v20 = vpop.eup %1098  ;;  %v587_v55 = vadd.f32 1.0, %v571_v41  ;;  %v603_v56 = vadd.f32 %v571_v41, %v539_v30  ;;  %v595_v61 = vadd.f32 1.0, %v579_v47  ;;  %v611_v62 = vadd.f32 %v579_v47, %v547_v45 }
 0x174   : > { %v1101_v52 = vpop.eup %1100  ;;  %v732_v53 = vmul.f32 %v1099_v20, %v700_v18  ;;  %v693_v58 = vsel %vm565_vm5, %v661_v50, %v677_v51  ;;  %v698_v2 = vmul.f32 %v618_v19, %v1506_v23  ;;  %v706_v6 = vmul.f32 %v626_v48, %v1509_v24 }
 0x175   : > { %v740_v57 = vmul.f32 %v1101_v52, %v708_v31  ;;  %1108 = vrcp.f32 %v693_v58  ;;  %v651_v3 = vadd.f32 %v635_v44, %v587_v55  ;;  %v667_v4 = vadd.f32 2.0, %v603_v56 }
 0x176   : > { %748 = vst [vmem:[%s1598_s10 + $0x10] sm:$0xff] %v732_v53  ;;  %v1103_v5 = vpop.eup %1102  ;;  %v701_v7 = vmul.f32 %v621_v54, %v1516_v33  ;;  %v643_v9 = vmul.f32 2.0, %v547_v45  ;;  %v675_v10 = vadd.f32 2.0, %v611_v62  ;;  %v629_v13 = vsel %vm565_vm5, %v597_v37, %v613_v38 }
 0x177   : > { %756 = vst [vmem:[%s1598_s10 + $0x50] sm:$0xff] %v740_v57  ;;  %v730_v12 = vmul.f32 %v1103_v5, %v698_v2  ;;  %v683_v15 = vsel %vm555_vm6, %v651_v3, %v667_v4  ;;  %v544_v23 = vmul.f32 %v1095_v36, %v1095_v36  ;;  %v576_v18 = vmul.f32 2.0, %v1095_v36 }
 0x178   : > { %1110 = vrcp.f32 %v683_v15  ;;  %v659_v17 = vadd.f32 %v643_v9, %v595_v61  ;;  %v552_v21 = vmul.f32 %v1097_v42, %v1097_v42  ;;  %v584_v25 = vmul.f32 2.0, %v1097_v42 }
 0x179   : > { %v1105_v22 = vpop.eup %1104  ;;  %746 = vst [vmem:[%s1598_s10] sm:$0xff] %v730_v12  ;;  %v640_v24 = vmul.f32 2.0, %v544_v23  ;;  %1112 = vpow2.f32 %v1558_v28  ;;  %v530_v33 = vmul.f32 1.442695, %v1565_v49  ;;  %v592_v29 = vadd.f32 1.0, %v576_v18 }
 0x17a   : > { %v738_v26 = vmul.f32 %v1105_v22, %v706_v6  ;;  %v691_v27 = vsel %vm563_vm7, %v659_v17, %v675_v10  ;;  %v608_v30 = vadd.f32 %v576_v18, %v544_v23  ;;  %v600_v31 = vadd.f32 1.0, %v584_v25 }
 0x17b   : > { %1114 = vrcp.f32 %v691_v27  ;;  %v616_v32 = vadd.f32 %v584_v25, %v552_v21  ;;  %v648_v35 = vmul.f32 2.0, %v552_v21  ;;  %v619_v19 = vsel %vm555_vm6, %v587_v55, %v603_v56 }
 0x17c   : > { %v1107_v36 = vpop.eup %1106  ;;  %754 = vst [vmem:[%s1598_s10 + $0x40] sm:$0xff] %v738_v26  ;;  %v656_v37 = vadd.f32 %v640_v24, %v592_v29  ;;  %v672_v28 = vadd.f32 2.0, %v608_v30  ;;  %1116 = vpow2.f32 %v530_v33  ;;  %v709_v41 = vmul.f32 %v629_v13, %v1519_v34 }
 0x17d   : > { %v733_v49 = vmul.f32 %v1107_v36, %v701_v7  ;;  %v664_v38 = vadd.f32 %v648_v35, %v600_v31  ;;  %v680_v43 = vadd.f32 2.0, %v616_v32  ;;  %v520_v44 = vmul.f32 1.442695, %v1572_v63 }
 0x17e   : > { %v688_v42 = vsel %vm560_vm8, %v656_v37, %v672_v28  ;;  %v699_v47 = vmul.f32 %v619_v19, %v1522_v39  ;;  %v489_v20 = vand.u32 2147483647, %v1554_v14  ;;  %v479_v48 = vand.u32 2147483647, %v1563_v46 }
 0x17f   : > { %v1109_v45 = vpop.eup %1108  ;;  %749 = vst [vmem:[%s1598_s10 + $0x18] sm:$0xff] %v733_v49  ;;  %1118 = vrcp.f32 %v688_v42  ;;  %v627_v34 = vsel %vm563_vm7, %v595_v61, %v611_v62  ;;  %v696_v51 = vsel %vm568_vm9, %v664_v38, %v680_v43  ;;  %v1633_v39 = vadd.f32 %v1497_v16, %v1540_v1 }
 0x180   : > { %v741_v50 = vmul.f32 %v1109_v45, %v709_v41  ;;  %1120 = vpow2.f32 %v520_v44  ;;  %v505_v63 = vsub.f32 0.0, %v489_v20  ;;  %v495_v52 = vsub.f32 0.0, %v479_v48 }
 0x181   : > { %1122 = vrcp.f32 %v696_v51  ;;  %v487_v58 = vand.u32 2147483647, %v1633_v39  ;;  %v707_v61 = vmul.f32 %v627_v34, %v1525_v40  ;;  %v624_v4 = vsel %vm560_vm8, %v592_v29, %v608_v30 }
 0x182   : > { %v1111_v53 = vpop.eup %1110  ;;  %757 = vst [vmem:[%s1598_s10 + $0x58] sm:$0xff] %v741_v50  ;;  %v536_v56 = vmul.f32 1.442695, %v505_v63  ;;  %v516_v57 = vmul.f32 1.442695, %v495_v52  ;;  %v632_v16 = vsel %vm568_vm9, %v600_v31, %v616_v32  ;;  %v704_v15 = vmul.f32 %v624_v4, %v1532_v59 }
 0x183   : > { %v1113_v54 = vpop.eup %1112  ;;  %v731_v55 = vmul.f32 %v1111_v53, %v699_v47  ;;  %v503_v1 = vsub.f32 0.0, %v487_v58  ;;  %v712_v26 = vmul.f32 %v632_v16, %v1535_v60  ;;  %vm561_vm12 = vcmp.ge.f32.partialorder %v1549_v11, 0.0 }
 0x184   : > { %v542_v62 = vmul.f32 %v1113_v54, %v1113_v54  ;;  %v574_v2 = vmul.f32 2.0, %v1113_v54  ;;  %1124 = vpow2.f32 %v536_v56  ;;  %vm569_vm13 = vcmp.ge.f32.partialorder %v1554_v14, 0.0 }
 0x185   : > { %v1115_v3 = vpop.eup %1114  ;;  %747 = vst [vmem:[%s1598_s10 + $0x8] sm:$0xff] %v731_v55  ;;  %1126 = vpow2.f32 %v516_v57  ;;  %v532_v13 = vmul.f32 1.442695, %v503_v1  ;;  %vm559_vm14 = vcmp.ge.f32.partialorder %v1563_v46, 0.0  ;;  %vm567_vm15 = vcmp.ge.f32.partialorder %v1633_v39, 0.0 }
 0x186   : > { %v1117_v5 = vpop.eup %1116  ;;  %v739_v6 = vmul.f32 %v1115_v3, %v707_v61  ;;  %v590_v7 = vadd.f32 1.0, %v574_v2  ;;  %v606_v9 = vadd.f32 %v574_v2, %v542_v62  ;;  %v638_v10 = vmul.f32 2.0, %v542_v62 }
 0x187   : > { %v550_v12 = vmul.f32 %v1117_v5, %v1117_v5  ;;  %v582_v40 = vmul.f32 2.0, %v1117_v5  ;;  %1128 = vpow2.f32 %v532_v13 }
 0x188   : > { %755 = vst [vmem:[%s1598_s10 + $0x48] sm:$0xff] %v739_v6  ;;  %v654_v23 = vadd.f32 %v638_v10, %v590_v7  ;;  %v670_v17 = vadd.f32 2.0, %v606_v9  ;;  %v622_v49 = vsel %vm558_vm10, %v590_v7, %v606_v9 }
 0x189   : > { %v1119_v18 = vpop.eup %1118  ;;  %v598_v21 = vadd.f32 1.0, %v582_v40  ;;  %v614_v22 = vadd.f32 %v582_v40, %v550_v12  ;;  %v646_v24 = vmul.f32 2.0, %v550_v12  ;;  %v702_v50 = vmul.f32 %v622_v49, %v1538_v0 }
 0x18a   : > { %v1121_v25 = vpop.eup %1120  ;;  %v736_v33 = vmul.f32 %v1119_v18, %v704_v15  ;;  %v686_v27 = vsel %vm558_vm10, %v654_v23, %v670_v17 }
 0x18b   : > { %v1123_v29 = vpop.eup %1122  ;;  %1130 = vrcp.f32 %v686_v27  ;;  %v662_v59 = vadd.f32 %v646_v24, %v598_v21  ;;  %v678_v30 = vadd.f32 2.0, %v614_v22  ;;  %v545_v32 = vmul.f32 %v1121_v25, %v1121_v25 }
 0x18c   : > { %752 = vst [vmem:[%s1598_s10 + $0x30] sm:$0xff] %v736_v33  ;;  %v744_v31 = vmul.f32 %v1123_v29, %v712_v26  ;;  %v577_v35 = vmul.f32 2.0, %v1121_v25  ;;  %v630_v52 = vsel %vm566_vm11, %v598_v21, %v614_v22 }
 0x18d   : > { %v694_v36 = vsel %vm566_vm11, %v662_v59, %v678_v30  ;;  %v641_v37 = vmul.f32 2.0, %v545_v32  ;;  %v710_v0 = vmul.f32 %v630_v52, %v1546_v8 }
 0x18e   : > { %760 = vst [vmem:[%s1598_s10 + $0x70] sm:$0xff] %v744_v31  ;;  %1132 = vrcp.f32 %v694_v36  ;;  %v593_v60 = vadd.f32 1.0, %v577_v35  ;;  %v609_v19 = vadd.f32 %v577_v35, %v545_v32  ;;  %v1125_v28 = vpop.eup %1124 }
 0x18f   : > { %v553_v42 = vmul.f32 %v1125_v28, %v1125_v28  ;;  %v1127_v43 = vpop.eup %1126  ;;  %v585_v44 = vmul.f32 2.0, %v1125_v28 }
 0x190   : > { %v657_v38 = vadd.f32 %v641_v37, %v593_v60  ;;  %v673_v41 = vadd.f32 2.0, %v609_v19  ;;  %v543_v20 = vmul.f32 %v1127_v43, %v1127_v43  ;;  %v575_v48 = vmul.f32 2.0, %v1127_v43 }
 0x191   : > { %v649_v47 = vmul.f32 2.0, %v553_v42  ;;  %v601_v34 = vadd.f32 1.0, %v585_v44  ;;  %v617_v51 = vadd.f32 %v585_v44, %v553_v42  ;;  %v1129_v63 = vpop.eup %1128  ;;  %v625_v5 = vsel %vm561_vm12, %v593_v60, %v609_v19 }
 0x192   : > { %v689_v45 = vsel %vm561_vm12, %v657_v38, %v673_v41  ;;  %v591_v53 = vadd.f32 1.0, %v575_v48  ;;  %v607_v54 = vadd.f32 %v575_v48, %v543_v20  ;;  %v639_v55 = vmul.f32 2.0, %v543_v20 }
 0x193   : > { %1134 = vrcp.f32 %v689_v45  ;;  %v665_v57 = vadd.f32 %v649_v47, %v601_v34  ;;  %v681_v58 = vadd.f32 2.0, %v617_v51  ;;  %v551_v61 = vmul.f32 %v1129_v63, %v1129_v63 }
 0x194   : > { %v655_v2 = vadd.f32 %v639_v55, %v591_v53  ;;  %v671_v4 = vadd.f32 2.0, %v607_v54  ;;  %v583_v16 = vmul.f32 2.0, %v1129_v63  ;;  %v705_v13 = vmul.f32 %v625_v5, %v1549_v11 }
 0x195   : > { %v1131_v56 = vpop.eup %1130  ;;  %v697_v3 = vsel %vm569_vm13, %v665_v57, %v681_v58  ;;  %v647_v6 = vmul.f32 2.0, %v551_v61  ;;  %v633_v18 = vsel %vm569_vm13, %v601_v34, %v617_v51  ;;  %v623_v21 = vsel %vm559_vm14, %v591_v53, %v607_v54 }
 0x196   : > { %v734_v62 = vmul.f32 %v1131_v56, %v702_v50  ;;  %1136 = vrcp.f32 %v697_v3  ;;  %v687_v9 = vsel %vm559_vm14, %v655_v2, %v671_v4  ;;  %v599_v8 = vadd.f32 1.0, %v583_v16 }
 0x197   : > { %v615_v10 = vadd.f32 %v583_v16, %v551_v61  ;;  %1138 = vrcp.f32 %v687_v9  ;;  %v713_v22 = vmul.f32 %v633_v18, %v1554_v14  ;;  %v703_v25 = vmul.f32 %v623_v21, %v1563_v46 }
 0x198   : > { %v1133_v1 = vpop.eup %1132  ;;  %750 = vst [vmem:[%s1598_s10 + $0x20] sm:$0xff] %v734_v62  ;;  %v663_v12 = vadd.f32 %v647_v6, %v599_v8 }
 0x199   : > { %v742_v7 = vmul.f32 %v1133_v1, %v710_v0  ;;  %v679_v40 = vadd.f32 2.0, %v615_v10  ;;  %v631_v26 = vsel %vm567_vm15, %v599_v8, %v615_v10 }
 0x19a   : > { %v711_v29 = vmul.f32 %v631_v26, %v1633_v39 }
 0x19b   : > { %758 = vst [vmem:[%s1598_s10 + $0x60] sm:$0xff] %v742_v7  ;;  %v695_v23 = vsel %vm567_vm15, %v663_v12, %v679_v40 }
 0x19c   : > { %1140 = vrcp.f32 %v695_v23 }
 0x19d   : > { %v1135_v15 = vpop.eup %1134 }
 0x19e   : > { %v737_v17 = vmul.f32 %v1135_v15, %v705_v13 }
 0x1a0   : > { %753 = vst [vmem:[%s1598_s10 + $0x38] sm:$0xff] %v737_v17  ;;  %v1137_v11 = vpop.eup %1136 }
 0x1a1   : > { %v745_v24 = vmul.f32 %v1137_v11, %v713_v22  ;;  %v1139_v33 = vpop.eup %1138 }
 0x1a2   : > { %v735_v27 = vmul.f32 %v1139_v33, %v703_v25 }
 0x1a3   : > { %761 = vst [vmem:[%s1598_s10 + $0x78] sm:$0xff] %v745_v24 }
 0x1a4   : > { %751 = vst [vmem:[%s1598_s10 + $0x28] sm:$0xff] %v735_v27 }
 0x1a6   : > { %v1141_v59 = vpop.eup %1140 }
 0x1a7   : > { %v743_v14 = vmul.f32 %v1141_v59, %v711_v29 }
 0x1a9   : > { %759 = vst [vmem:[%s1598_s10 + $0x68] sm:$0xff] %v743_v14 }
 0x1aa   : > { %1213 = shalt.err (!%p1210_p5)
}
 0x1ab   : > { %s1214_s29 = scalar_lea.hbm %s1690_s25, 2048  ;;  %s1218_s20 = scalar_lea.hbm %s1744_s3, 8192 }
 0x1ac   : > { %p1215_p9 = scmp.ne.s32.totalorder %s1690_s25, %s1214_s29  ;;  %p1219_p3 = scmp.lt.u32.totalorder %s1690_s25, %s1744_s3 }
 0x1ad   : > { %p1220_p7 = scmp.lt.u32.totalorder %s1218_s20, %s1214_s29  ;;  %p1222_p4 = scmp.lt.u32.totalorder %s1214_s29, %s1690_s25 }
 0x1ae   : > { %p1216_p1 = pnand %p1215_p9, %p1413_p11 }
 0x1af   : > { %p1221_p13 = por %p1220_p7, %p1219_p3 }
 0x1b0   : > { %p1217_p2 = pneg %p1216_p1 }
 0x1b1   : > { %p1223_p6 = por %p1222_p4, %p1221_p13 }
 0x1b3   : > { %p1224_p8 = pnand %p1223_p6, %p1217_p2 }
 0x1b5   : > { %1227 = shalt.err (!%p1224_p8)
}
 0x1b6   : > { %s1293_s10 = smov 128   ;;  %s1294_s11 = smov 8  }
 0x1b7   : > { %991 = dma.vmem_to_hbm [thread:$0]  (%p1413_p11), %s1692_s9, 2048, %s1690_s25, %s763_s26, %s1293_s10, %s1293_s10, %s1294_s11  }
 0x1b8 PF: > { %p1008_p12 = scmp.ge.s32.totalorder %s1286_s17, 2  ;;  %s792_s18 = sand.u32 1, %s1266_s12  }
 0x1b9   : > { %p1762_p10 = scmp.ne.s32.totalorder %s1752_s23, 0  ;;  %s793_s19 = scalar_lea.sflag [#allocation4], %s792_s18 }
 0x1bb   : > { %p1002_p0 = pnand %p1008_p12, %p1762_p10 }
 0x1bd   : > { %1261 = dma.done.wait (!%p1002_p0), %s793_s19, 2048  }
 0x1be   : > { %1263 = vsyncadd (!%p1002_p0), %s793_s19, 4294965248  ;;  %s20_s17 = sadd.s32 1, %s1286_s17   ;;  %s1763_s12 = smov %s1270_s13 }
 0x1bf   : > { %p17_p5 = scmp.ge.s32.totalorder %s20_s17, 6   ;;  %s1764_s13 = smov %s1274_s14 }
 0x1c0   : > { %s1765_s14 = smov %s1422_s5  ;;  %s1766_s15 = smov %s1282_s16 }
 0x1c1   : > { %s1767_s16 = smov %s1769_s28  ;;  %19 = sbr.rel (!%p17_p5) target bundleno = 7 (0x7), region = 85 }
 0x1c8   :  { %798 = vsyncpa [#allocation3], 1 }
 0x1c9   :  { %800 = vsyncpa [#allocation3 + $0x1], 1 }
 0x1ca   :  { %801 = vsyncpa [#allocation6], 1 }
 0x1cb   :  { %802 = vsyncpa [#allocation4], 1 }
 0x1cc   :  { %804 = vsyncpa [#allocation4 + $0x1], 1 }

</bundles_post_ra>
